<compile_context>
chip_gen: v5e
topology: v5e:2x2
jax: 0.10.0
libtpu: 0.0.40
codegen_flags: <defaults>
</compile_context>

<pallas_src>
import jax
import jax.numpy as jnp
from jax.experimental import pallas as pl
from jax.experimental.pallas import tpu as pltpu


def _residual_linear_kernel(x_ref, w_ref, b_ref, o_ref):
    # o[:, jTN:(j+1)TN] = (x_bf16 @ W_bf16[:, jTN:(j+1)TN])_f32acc + b + x[:, jTN:(j+1)TN]
    tn = o_ref.shape[-1]
    x = x_ref[...]                                              # (TM, H) f32
    y = jnp.dot(x.astype(jnp.bfloat16), w_ref[...],
                preferred_element_type=jnp.float32)             # (TM, TN) f32
    if tn == x_ref.shape[-1]:
        res = x                                                 # grid_n == 1 path
    else:
        col = pl.multiple_of(pl.program_id(1) * tn, tn)
        res = x_ref[:, pl.ds(col, tn)]                          # residual column slice, f32
    o_ref[...] = (y + b_ref[...] + res).astype(o_ref.dtype)


def _round_up(v, m):
    return ((v + m - 1) // m) * m


def _choose_tiles(M, H):
    # N tile: lane-dense 512-wide column tiles of W/out when H is a multiple
    # of 128; otherwise use the full (unpadded) H -- full-dim blocks are legal
    # and avoid activation pad/slice HBM passes (masked stores instead).
    TN = min(H, 512) if H % 128 == 0 else H
    # M tile: ~4 MiB f32 x tile, clamped to [8, 2048] rows, 8-sublane grain.
    TM = max(8, min(2048, _round_up(max((4 << 20) // (4 * H), 1), 8)))
    if TM >= M:
        # Still give the pipeline (and v7x's two TensorCores) >= 2 row tiles
        # whenever M allows it.
        TM = _round_up(pl.cdiv(M, 2), 8) if M > 8 else _round_up(M, 8)
    return TM, TN


def prepare_linear_params(w, b):
    """One-time parameter prep, hoisted off the per-call hot path.

    W -> bf16 for the MXU (halves its HBM/VMEM cost); bias stays f32 and is
    reshaped to (1, H) for broadcast inside the kernel.
    """
    return w.astype(jnp.bfloat16), b.astype(jnp.float32).reshape(1, -1)


def residual_add_linear(x, w_bf16, b2d):
    """ResidualAdd(Linear) forward: fn(x) + x, fused in one Pallas kernel.

    x:      (B, S, H) float32
    w_bf16: (H, H)    bfloat16, laid out (H_in, H_out)  [from prepare_linear_params]
    b2d:    (1, H)    float32                            [from prepare_linear_params]
    """
    B, S, H = x.shape
    M = B * S
    x2d = x.reshape(M, H)

    TM, TN = _choose_tiles(M, H)
    grid_m = pl.cdiv(M, TM)
    grid_n = pl.cdiv(H, TN)

    # W/b block index is constant across the grid when grid_n == 1 -> single
    # buffer them. When grid_n > 1, keep W double-buffered so its per-column
    # tile DMA overlaps compute (its footprint is already bounded by TN).
    # TODO(synk): the K (reduction) axis stays untiled; if H alone outgrows a
    # few MiB of x tile, add K tiling with an f32 accumulator and add the
    # residual on the last K step.
    w_bufs = 1 if grid_n == 1 else 2
    b_bufs = 1 if grid_n == 1 else 2

    vmem_bytes = (2 * TM * H * 4            # x tile, double-buffered, f32
                  + w_bufs * H * TN * 2     # W tile, bf16
                  + b_bufs * TN * 4         # bias tile, f32
                  + 2 * TM * TN * 4)        # out tile, double-buffered, f32
    vmem_limit = max(16 << 20, min(56 << 20, 2 * vmem_bytes + (4 << 20)))

    cost = pl.CostEstimate(
        flops=2 * M * H * H,
        transcendentals=0,
        bytes_accessed=4 * M * H + 2 * H * H + 4 * H + 4 * M * H,
    )

    out2d = pl.pallas_call(
        _residual_linear_kernel,
        out_shape=jax.ShapeDtypeStruct((M, H), x.dtype),
        grid_spec=pl.GridSpec(
            grid=(grid_m, grid_n),
            in_specs=[
                pl.BlockSpec((TM, H), lambda i, j: (i, 0)),          # x rows (pipelined)
                pl.BlockSpec((H, TN), lambda i, j: (0, j),
                             pipeline_mode=pl.Buffered(w_bufs)),     # W column tile (bf16)
                pl.BlockSpec((1, TN), lambda i, j: (0, j),
                             pipeline_mode=pl.Buffered(b_bufs)),     # bias tile (f32)
            ],
            out_specs=pl.BlockSpec((TM, TN), lambda i, j: (i, j)),
        ),
        compiler_params=pltpu.CompilerParams(
            # Row and output-column tiles are independent -> both axes can be
            # sharded across v7x's two TensorCores (no-op on v5e/v6e).
            dimension_semantics=("parallel", "parallel"),
            vmem_limit_bytes=vmem_limit,
        ),
        cost_estimate=cost,
    )(x2d, w_bf16, b2d)

    return out2d.reshape(B, S, H)


if __name__ == "__main__":
    B, S, H = 2, 8, 32

    key = jax.random.PRNGKey(0)
    kx, kw, kb = jax.random.split(key, 3)

    x = jax.random.normal(kx, (B, S, H), dtype=jnp.float32)
    # Deterministic Linear(H, H) parameters (synthetic, not a checkpoint load).
    w = (jax.random.uniform(kw, (H, H), dtype=jnp.float32) - 0.5) * (2.0 / jnp.sqrt(H))
    b = (jax.random.uniform(kb, (H,), dtype=jnp.float32) - 0.5) * (2.0 / jnp.sqrt(H))

    # One-time parameter prep (hoisted off the per-call hot path).
    w_bf16, b2d = prepare_linear_params(w, b)

    fwd = jax.jit(residual_add_linear)
    out = fwd(x, w_bf16, b2d)
    jax.block_until_ready(out)

    # Reference using the same documented precision (bf16 operands, f32 acc).
    ref = jnp.einsum("bsh,hk->bsk", x.astype(jnp.bfloat16), w_bf16,
                     preferred_element_type=jnp.float32) + b + x
    assert out.shape == x.shape, "shape mismatch"
    assert jnp.allclose(out, ref, atol=1e-4, rtol=1e-4), "mismatch vs bf16 reference"

    # Loose sanity check against the pure-f32 module semantics.
    ref_f32 = jnp.einsum("bsh,hk->bsk", x, w) + b + x
    assert jnp.allclose(out, ref_f32, atol=1e-1, rtol=1e-1), "mismatch vs f32 reference"

    print("KERNEL_OK")
</pallas_src>

<mosaic_0001>
module attributes {stable_mosaic.version = 11 : i64} {
  func.func @_residual_linear_kernel(%arg0: i32, %arg1: i32, %arg2: memref<8x32xf32, #tpu.memory_space<vmem>>, %arg3: memref<32x32xbf16, #tpu.memory_space<vmem>>, %arg4: memref<1x32xf32, #tpu.memory_space<vmem>>, %arg5: memref<8x32xf32, #tpu.memory_space<vmem>>) attributes {dimension_semantics = [#tpu.dimension_semantics<parallel>, #tpu.dimension_semantics<parallel>], iteration_bounds = array<i64: 2, 1>, scalar_prefetch = 0 : i64, scratch_operands = 0 : i64, tpu.core_type = #tpu.core_type<tc>, window_params = [{transform_indices = @transform_0, window_bounds = array<i64: 8, 32>}, {pipeline_mode = #tpu.pipeline_mode<synchronous>, transform_indices = @transform_1, window_bounds = array<i64: 32, 32>}, {pipeline_mode = #tpu.pipeline_mode<synchronous>, transform_indices = @transform_2, window_bounds = array<i64: 1, 32>}, {transform_indices = @transform_3, window_bounds = array<i64: 8, 32>}]} {
    %c0 = arith.constant 0 : index
    %c0_0 = arith.constant 0 : index
    %0 = vector.load %arg2[%c0, %c0_0] : memref<8x32xf32, #tpu.memory_space<vmem>>, vector<8x32xf32>
    %1 = arith.truncf %0 : vector<8x32xf32> to vector<8x32xbf16>
    %c0_1 = arith.constant 0 : index
    %c0_2 = arith.constant 0 : index
    %2 = vector.load %arg3[%c0_1, %c0_2] : memref<32x32xbf16, #tpu.memory_space<vmem>>, vector<32x32xbf16>
    %cst = arith.constant dense<0.000000e+00> : vector<8x32xf32>
    %3 = tpu.matmul %1, %2, %cst {dimension_numbers = #tpu.dot_dimension_numbers<[1], [0], [0], [1], [0, 0, 1, 1], [], []>} : vector<8x32xbf16>, vector<32x32xbf16>, vector<8x32xf32> -> vector<8x32xf32>
    %c0_3 = arith.constant 0 : index
    %c0_4 = arith.constant 0 : index
    %4 = vector.load %arg4[%c0_3, %c0_4] : memref<1x32xf32, #tpu.memory_space<vmem>>, vector<1x32xf32>
    %5 = vector.broadcast %4 : vector<1x32xf32> to vector<8x32xf32>
    %6 = arith.addf %3, %5 : vector<8x32xf32>
    %7 = arith.addf %6, %0 : vector<8x32xf32>
    %c0_5 = arith.constant 0 : index
    %c0_6 = arith.constant 0 : index
    %8 = vector.load %arg5[%c0_5, %c0_6] : memref<8x32xf32, #tpu.memory_space<vmem>>, vector<8x32xf32>
    tpu.vector_store %arg5[%c0_5, %c0_6], %7 {strides = array<i32>} : memref<8x32xf32, #tpu.memory_space<vmem>>, vector<8x32xf32>,
    return
  }
  func.func @transform_0(%arg0: i32, %arg1: i32) -> (i32, i32) {
    %c0_i32 = arith.constant 0 : i32
    %c0_i32_0 = arith.constant 0 : i32
    return %arg0, %c0_i32 : i32, i32
  }
  func.func @transform_1(%arg0: i32, %arg1: i32) -> (i32, i32) {
    %c0_i32 = arith.constant 0 : i32
    %c0_i32_0 = arith.constant 0 : i32
    return %c0_i32, %arg1 : i32, i32
  }
  func.func @transform_2(%arg0: i32, %arg1: i32) -> (i32, i32) {
    %c0_i32 = arith.constant 0 : i32
    %c0_i32_0 = arith.constant 0 : i32
    return %c0_i32, %arg1 : i32, i32
  }
  func.func @transform_3(%arg0: i32, %arg1: i32) -> (i32, i32) {
    %c0_i32 = arith.constant 0 : i32
    return %arg0, %arg1 : i32, i32
  }
}

</mosaic_0001>

<bundles_post_ra>
// kernel: residual_add_linear.1
= control target key start
LH: loop header
LB: loop body
LE: loop exit
PB: predicated region body
PF: predicated region fallthrough
CT: control target
= control target key end

     0   :  { %8 = vsyncpa [#allocation3], 0  ;;  %s822_s0 = inlined_call_operand.hbm [shape: f32[16,32], index: 0, kind: input, shape index: {}]   ;;  %s823_s1 = inlined_call_operand.hbm [shape: bf16[32,32], index: 1, kind: input, shape index: {}]   ;;  %s824_s2 = inlined_call_operand.vmem [shape: f32[1,32], index: 2, kind: input, shape index: {}]   ;;  %s825_s3 = inlined_call_operand.hbm [shape: f32[16,32], index: 3, kind: output, shape index: {}]  }
   0x1   :  { %10 = vsyncpa [#allocation3 + $0x1], 0 }
   0x2   :  { %11 = vsyncpa [#allocation6], 0 }
   0x3   :  { %12 = vsyncpa [#allocation4], 0 }
   0x4   :  { %14 = vsyncpa [#allocation4 + $0x1], 0  ;;  %s676_s12 = smov 0   ;;  %s678_s13 = smov 0  }
   0x5   :  { %s680_s14 = smov 0   ;;  %s682_s15 = smov 0  }
   0x6   :  { %s684_s16 = smov 0   ;;  %s686_s17 = smov 0  }
   0x7 LB: > { %s402_s18 = sadd.s32 4294967295, %s651_s17   ;;  %p404_p0 = scmp.ge.s32.totalorder %s651_s17, 1  ;;  %s651_s17 = sphi %s686_s17, %s20_s17   ;;  %s647_s16 = sphi %s684_s16, %s836_s16   ;;  %s643_s15 = sphi %s682_s15, %s835_s15   ;;  %s639_s14 = sphi %s680_s14, %s834_s14   ;;  %s635_s13 = sphi %s678_s13, %s833_s13   ;;  %s631_s12 = sphi %s676_s12, %s832_s12  }
   0x8   : > { %p708_p1 = scmp.eq.s32.totalorder %s402_s18, 0  ;;  %p143_p2 = scmp.lt.s32.totalorder %s651_s17, 3 }
   0x9   : > { %s156_s22 = sshll.u32 %s823_s1, 4  ;;  %s653_s24 = smov [#allocation5]   ;;  %s157_s22 = int_to_ptr.hbm [resolvable:$true] %s156_s22 }
   0xa   : > { %p716_p3 = pnand %p404_p0, %p143_p2  ;;  %s158_s25 = sshll.u32 %s653_s24, 4  ;;  %s159_s25 = int_to_ptr.vmem [resolvable:$true] %s158_s25 }
   0xb   : > { %p407_p6 = scmp.ge.s32.totalorder %s651_s17, 2  ;;  %s654_s26 = smov 64  }
   0xc   : > { %p437_p4 = pneg %p716_p3  ;;  %s655_s27 = smov 4  }
   0xd   : > { %s403_s28 = sadd.s32 4294967294, %s651_s17   ;;  %s32_s29 = sadd.s32 1, %s647_s16 }
   0xe   : > { %p438_p5 = pnand %p437_p4, %p708_p1  ;;  %s39_s30 = sadd.s32 1, %s639_s14 }
   0xf   : > { %p34_p7 = scmp.ge.s32.totalorder %s32_s29, 2  ;;  %p46_p8 = scmp.ne.s32.totalorder %s639_s14, %s635_s13 }
  0x10   : > { %440 = dma.hbm_to_vmem [thread:$0]  (!%p438_p5), %s157_s22, 256, %s159_s25, [#allocation6], %s654_s26, %s654_s26, %s655_s27  }
  0x11   : > { %p47_p9 = scmp.eq.s32.totalorder %s651_s17, 0  ;;  %p52_p10 = scmp.ne.s32.totalorder %s635_s13, %s631_s12 }
  0x12   : > { %s838_s29 = smov (%p34_p7, %s32_s29), 0  ;;  %p130_p13 = scmp.eq.s32.totalorder %s402_s18, 1 }
  0x13   : > { %p735_p11 = por %p47_p9, %p46_p8  ;;  %p741_p12 = por %p708_p1, %p52_p10 }
  0x14   : > { %s36_s6 = ssub.s32 %s647_s16, %s838_s29  ;;  %p136_p2 = scmp.eq.s32.totalorder %s403_s28, 1 }
  0x15   : > { %p37_p0 = scmp.eq.s32.totalorder %s36_s6, 0  ;;  %p747_p4 = por %p130_p13, %p46_p8 }
  0x16   : > { %p450_p5 = scmp.lt.s32.totalorder %s651_s17, 2  ;;  %p755_p7 = por %p136_p2, %p52_p10 }
  0x17   : > { %s753_s8 = scalar_select %p37_p0, %s639_s14, %s39_s30  }
  0x18   : > { %s178_s10 = sand.u32 1, %s639_s14   ;;  %s409_s20 = sshll.u32 %s647_s16, 3 }
  0x19   : > { %s408_s11 = sshll.u32 %s178_s10, 3  ;;  %s186_s18 = scalar_lea.hbm %s822_s0, %s409_s20 }
  0x1a   : > { %s182_s24 = scalar_lea.vmem [#allocation2], %s408_s11  ;;  %s188_s26 = sshll.u32 %s186_s18, 4  ;;  %s189_s26 = int_to_ptr.hbm [resolvable:$true] %s188_s26 }
  0x1b   : > { %s190_s25 = sshll.u32 %s182_s24, 4  ;;  %p442_p8 = pnand %p450_p5, %p735_p11  ;;  %s191_s25 = int_to_ptr.vmem [resolvable:$true] %s190_s25 }
  0x1c   : > { %s179_s27 = scalar_lea.sflag [#allocation3], %s178_s10  ;;  %199 = sbr.rel (%p716_p3) target bundleno = 178 (0xb2), region = 32 }
  0x1d   : > { %444 = dma.hbm_to_vmem [thread:$0]  (!%p442_p8), %s189_s26, 128, %s191_s25, %s179_s27  }
  0x1e   : > { %s769_s28 = sand.u32 (!%p716_p3), 1, %s635_s13  }
  0x1f   : > { %s411_s30 = sshll.u32 (!%p716_p3), %s769_s28, 3  ;;  %s202_s6 = scalar_lea.sflag (!%p716_p3), [#allocation3], %s769_s28 }
  0x20   : > { %s205_s11 = scalar_lea.vmem (!%p716_p3), [#allocation2], %s411_s30 }
  0x21   : > { %618 = dma.done.wait (%p741_p12), %s202_s6, 128  }
  0x22   : > { %620 = vsyncadd (%p741_p12), %s202_s6, 4294967168 }
  0x23   : > { %622 = dma.done.wait (%p708_p1), [#allocation6], 256  }
  0x24   : > { %624 = vsyncadd (%p708_p1), [#allocation6], 4294967040  ;;  %v428_v0 = vld [vmem:[#allocation5 + $0x8] sm:$0xff]  ;;  %v427_v1 = vld [vmem:[#allocation5] sm:$0xff]  ;;  %vm263_vm0 = vcmask 261120   ;;  %s424_s23 = sshll.u32 %s643_s15, 3 }
  0x25   : > { %273 = vmatpush.bf16.msra.mxu0 %v428_v0  ;;  %v241_v2 = vld [vmem:[%s205_s11] sm:$0xff]  ;;  %s294_s19 = scalar_lea.hbm %s825_s3, %s424_s23  ;;  %s236_s21 = scalar_lea.vmem [#allocation7], %s411_s30 }
  0x26   : > { %v242_v3 = vpack.c.bf16 %v241_v2, %v241_v2  ;;  %v504_v4 = vld [vmem:[%s824_s2] ss:$0 sm:$0xff]  ;;  %s296_s22 = sshll.u32 %s236_s21, 4  ;;  %s298_s18 = sshll.u32 %s294_s19, 4  ;;  %s297_s22 = int_to_ptr.vmem [resolvable:$true] %s296_s22  ;;  %s299_s18 = int_to_ptr.hbm [resolvable:$true] %s298_s18 }
  0x27   : > { %s283_s24 = scalar_lea.sflag [#allocation4], %s769_s28  ;;  %s579_s15 = sshra.s32 %s299_s18, 4  ;;  %s580_s15 = int_to_ptr.hbm [resolvable:$true] %s579_s15 }
  0x28   : > { %s581_s25 = scalar_lea.hbm %s580_s15, 8  ;;  %s585_s6 = scalar_lea.hbm %s825_s3, 16 }
  0x29   : > { %274 = vmatpush.bf16.msra.mxu0 %v427_v1  ;;  %p582_p1 = scmp.ne.s32.totalorder %s580_s15, %s581_s25  ;;  %p586_p10 = scmp.lt.s32.totalorder %s580_s15, %s825_s3 }
  0x2a   : > { %p587_p11 = scmp.lt.s32.totalorder %s585_s6, %s581_s25 }
  0x2b   : > { %p583_p3 = pnand %p582_p1, %p747_p4 }
  0x2c   : > { %422 = vmatmul.msk.bf16.vlgmr.msra.gmra.mxu0 %vm263_vm0, %v242_v3  ;;  %p588_p12 = por %p587_p11, %p586_p10 }
  0x2d   : > { %p584_p9 = pneg %p583_p3 }
  0x2f   : > { %p589_p13 = pnand %p588_p12, %p584_p9 }
  0xa9   : > { %v276_v5 = vpop.f32.mrf.mxu0 }
  0xaa   : > { %v277_v6 = vadd.f32 %v504_v4, %v276_v5 }
  0xac   : > { %v280_v7 = vadd.f32 %v277_v6, %v241_v2 }
  0xae   : > { %281 = vst.msk [vmem:[%s236_s21] sm:$0xff] %vm263_vm0, %v280_v7 }
  0xaf   : > { %592 = shalt.err (!%p589_p13)
}
  0xb0   : > { %435 = dma.vmem_to_hbm [thread:$0]  (%p747_p4), %s297_s22, 128, %s299_s18, %s283_s24  }
  0xb1   : > { %v278_v8 = vpop.f32.mrf.mxu0 }
  0xb2 PF: > { %s310_s28 = sand.u32 1, %s631_s12   ;;  %p446_p0 = pnand %p407_p6, %p755_p7 }
  0xb3   : > { %s311_s23 = scalar_lea.sflag [#allocation4], %s310_s28 }
  0xb4   : > { %p447_p2 = pneg %p446_p0 }
  0xb6   : > { %626 = dma.done.wait (%p447_p2), %s311_s23, 128  }
  0xb7   : > { %628 = vsyncadd (%p447_p2), %s311_s23, 4294967168  ;;  %s20_s17 = sadd.s32 1, %s651_s17   ;;  %s832_s12 = smov %s635_s13 }
  0xb8   : > { %p17_p5 = scmp.ge.s32.totalorder %s20_s17, 4   ;;  %s833_s13 = smov %s639_s14 }
  0xb9   : > { %s834_s14 = smov %s753_s8  ;;  %s835_s15 = smov %s647_s16 }
  0xba   : > { %s836_s16 = smov %s838_s29  ;;  %19 = sbr.rel (!%p17_p5) target bundleno = 7 (0x7), region = 85 }
  0xbf   :  { %317 = vsyncpa [#allocation3], 1 }
  0xc0   :  { %319 = vsyncpa [#allocation3 + $0x1], 1 }
  0xc1   :  { %320 = vsyncpa [#allocation6], 1 }
  0xc2   :  { %321 = vsyncpa [#allocation4], 1 }
  0xc3   :  { %323 = vsyncpa [#allocation4 + $0x1], 1 }

</bundles_post_ra>
